<compile_context>
chip_gen: v5e
topology: v5e:2x2
jax: 0.10.0
libtpu: 0.0.40
codegen_flags: <defaults>
</compile_context>

<pallas_src>
import functools

import jax
import jax.numpy as jnp
from jax.experimental import pallas as pl
from jax.experimental.pallas import tpu as pltpu

LANE = 128


def _round_up(x, m):
    return ((x + m - 1) // m) * m


def _cdiv(a, b):
    return (a + b - 1) // b


def _heads_matmul_kernel(x_ref, w_ref, o_ref, *, precision):
    # One fused MXU matmul per tile: [tm, reprs] @ [reprs, tn] -> [tm, tn]
    o_ref[...] = jnp.dot(
        x_ref[...],
        w_ref[...],
        preferred_element_type=jnp.float32,
        precision=precision,
    ).astype(o_ref.dtype)


def build_fused_head_weights(head_weights, reprs_dims, dtype=jnp.float32):
    """Build the fused weight ONCE (hoisted out of the forward path).

    Args:
      head_weights: list of per-head weights in PyTorch nn.Linear layout
                    [out_i, reprs_dims] (bias=False).  (An int `output_dims`
                    in the module is just a single-element list here.)
      reprs_dims:   decision-representation width.
      dtype:        activation dtype the kernel will run in.

    Returns:
      (w_cat, col_meta, n_total):
        w_cat    [reprs_dims, n_pad]  compact columns of all heads, total padded to 128.
        col_meta tuple of (start_col, out_i) per head into the compact layout.
        n_total  sum of real output dims.
    """
    cols = []
    col_meta = []
    start = 0
    for w in head_weights:
        out_i, in_i = w.shape
        assert in_i == reprs_dims, "head weight in_features must equal reprs_dims"
        cols.append(jnp.asarray(w, dtype=dtype).T)  # [reprs, out_i]
        col_meta.append((start, out_i))
        start += out_i
    n_total = start
    w_compact = jnp.concatenate(cols, axis=1) if len(cols) > 1 else cols[0]
    n_pad = _round_up(max(n_total, 1), LANE)  # pad only the TOTAL to a lane multiple
    if n_pad != n_total:
        w_cat = jnp.pad(w_compact, ((0, 0), (0, n_pad - n_total)))
    else:
        w_cat = w_compact
    return w_cat, tuple(col_meta), n_total


def _tpu_generation_caps():
    """(vmem_cap_bytes, prefer_two_m_tiles) based on the attached TPU generation."""
    kind = ""
    try:
        kind = jax.devices()[0].device_kind.lower()
    except Exception:
        pass
    if "v7" in kind:
        # v7x: 64 MiB/TC physical -> leave headroom; 2 TCs want >= 2 batch tiles.
        return 52 << 20, True
    if "v6" in kind or "v5" in kind:
        # v5e / v6e: 128 MiB physical -> allow large tiles.
        return 100 << 20, False
    return 64 << 20, False


def tabnet_head_forward(x, fused, *, block_m=1024, force_pallas=False):
    """TabNetHead forward: returns [x @ W_i.T for each head], same order as the module.

    Args:
      x:     [batch, reprs_dims] activations.
      fused: output of build_fused_head_weights (built once at setup).
    """
    w_cat, col_meta, n_total = fused
    batch, reprs = x.shape
    n_pad = w_cat.shape[1]
    out_dtype = x.dtype
    w_cat = w_cat.astype(out_dtype)

    itemsize = jnp.dtype(out_dtype).itemsize
    sublane = max(8, 32 // itemsize)  # 8 for f32, 16 for bf16, 32 for int8/fp8
    precision = jax.lax.Precision.HIGHEST if out_dtype == jnp.float32 else None

    # ---- small-problem fast path: pallas_call setup would dominate ---------------
    if not force_pallas and batch < 4 * sublane and n_total <= LANE:
        full = jnp.dot(
            x, w_cat, preferred_element_type=jnp.float32, precision=precision
        ).astype(out_dtype)
        return [full[:, s:s + d] for (s, d) in col_meta]

    vmem_cap, prefer_two_tiles = _tpu_generation_caps()

    # ---- N tiling: resident weight if small, streamed over a grid axis otherwise --
    if reprs * n_pad * itemsize <= (8 << 20):
        tn = n_pad
        n_tiles = 1
        w_buffers = 1  # single-buffered resident weight
    else:
        # Pick the largest 128-multiple divisor of n_pad whose block is <= ~4 MiB.
        max_units = max(1, ((4 << 20) // (reprs * itemsize)) // LANE)
        k = n_pad // LANE
        d = max(1, min(max_units, k))
        while k % d != 0:
            d -= 1
        tn = d * LANE
        n_tiles = k // d
        w_buffers = 2  # streamed -> default double-buffer

    # ---- M tiling: balanced tiles (no near-double padding), dtype-aware sublane ---
    m_splits = max(1, _cdiv(batch, block_m))
    if prefer_two_tiles and m_splits == 1 and batch > sublane:
        m_splits = 2  # give both v7x TensorCores a batch tile
    tm = _round_up(_cdiv(batch, m_splits), sublane)

    # Bound tm by the VMEM budget (double-buffered x/out tiles + weight buffers).
    headroom = 2 << 20
    per_row_bytes = 2 * (reprs + tn) * itemsize
    usable = vmem_cap - headroom - w_buffers * reprs * tn * itemsize
    tm_vmem = max(sublane, (usable // per_row_bytes) // sublane * sublane)
    tm = max(sublane, min(tm, tm_vmem))

    batch_pad = _round_up(batch, tm)
    if batch_pad != batch:
        x = jnp.pad(x, ((0, batch_pad - batch), (0, 0)))  # zero rows, sliced off below
    m_tiles = batch_pad // tm

    vmem_need = (w_buffers * reprs * tn + 2 * tm * reprs + 2 * tm * tn) * itemsize
    vmem_limit = int(min(max(2 * vmem_need, 32 << 20), vmem_cap))

    # Weight BlockSpec: resident + single-buffered when it never changes.
    if n_tiles == 1:
        try:
            w_spec = pl.BlockSpec(
                (reprs, tn), lambda i, j: (0, 0), pipeline_mode=pl.Buffered(1)
            )
        except TypeError:  # older jax without pipeline_mode kwarg
            w_spec = pl.BlockSpec((reprs, tn), lambda i, j: (0, 0))
    else:
        w_spec = pl.BlockSpec((reprs, tn), lambda i, j: (0, j))

    kernel = functools.partial(_heads_matmul_kernel, precision=precision)

    out = pl.pallas_call(
        kernel,
        out_shape=jax.ShapeDtypeStruct((batch_pad, n_pad), out_dtype),
        grid_spec=pltpu.PrefetchScalarGridSpec(
            num_scalar_prefetch=0,
            grid=(m_tiles, n_tiles),
            in_specs=[
                pl.BlockSpec((tm, reprs), lambda i, j: (i, 0)),
                w_spec,
            ],
            out_specs=pl.BlockSpec((tm, tn), lambda i, j: (i, j)),
        ),
        compiler_params=pltpu.CompilerParams(
            dimension_semantics=("parallel", "parallel"),
            vmem_limit_bytes=vmem_limit,
        ),
    )(x, w_cat)

    # ---- un-pad: real batch rows and each head's real (compact) output columns ----
    return [out[:batch, s:s + d] for (s, d) in col_meta]


# ---------------- pure-JAX reference (mirrors the PyTorch forward) ----------------
def tabnet_head_ref(x, head_weights):
    return [x @ w.T for w in head_weights]


if __name__ == "__main__":
    # Small shapes consistent with the module's forward (multi-task head).
    batch = 256
    reprs_dims = 32
    output_dims = [5, 3]  # list -> multi-task; an int would be a single head

    key = jax.random.PRNGKey(0)
    keys = jax.random.split(key, 1 + len(output_dims))

    x = jax.random.normal(keys[0], (batch, reprs_dims), dtype=jnp.float32)

    # Deterministic synthetic weights in PyTorch nn.Linear layout [out, in].
    head_weights = [
        0.1 * jax.random.normal(keys[1 + i], (d, reprs_dims), dtype=jnp.float32)
        for i, d in enumerate(output_dims)
    ]

    # Fused weight built ONCE (hoisted out of the per-forward path).
    fused = build_fused_head_weights(head_weights, reprs_dims, dtype=jnp.float32)

    # force_pallas=True so the test exercises the Pallas kernel (the fast path
    # exists for tiny production calls).
    outs = tabnet_head_forward(x, fused, force_pallas=True)
    outs = jax.block_until_ready(outs)

    refs = tabnet_head_ref(x, head_weights)

    assert len(outs) == len(output_dims)
    for o, r, d in zip(outs, refs, output_dims):
        assert o.shape == (batch, d)
        assert jnp.allclose(o, r, atol=1e-5, rtol=1e-5), "mismatch vs reference"

    print("KERNEL_OK")
</pallas_src>

<mosaic_0001>
module attributes {stable_mosaic.version = 11 : i64} {
  func.func @_heads_matmul_kernel(%arg0: i32, %arg1: i32, %arg2: memref<256x32xf32, #tpu.memory_space<vmem>>, %arg3: memref<32x128xf32, #tpu.memory_space<vmem>>, %arg4: memref<256x128xf32, #tpu.memory_space<vmem>>) attributes {dimension_semantics = [#tpu.dimension_semantics<parallel>, #tpu.dimension_semantics<parallel>], iteration_bounds = array<i64: 1, 1>, scalar_prefetch = 0 : i64, scratch_operands = 0 : i64, tpu.core_type = #tpu.core_type<tc>, window_params = [{transform_indices = @transform_0, window_bounds = array<i64: 256, 32>}, {pipeline_mode = #tpu.pipeline_mode<synchronous>, transform_indices = @transform_1, window_bounds = array<i64: 32, 128>}, {transform_indices = @transform_2, window_bounds = array<i64: 256, 128>}]} {
    %c0 = arith.constant 0 : index
    %c0_0 = arith.constant 0 : index
    %0 = vector.load %arg2[%c0, %c0_0] : memref<256x32xf32, #tpu.memory_space<vmem>>, vector<256x32xf32>
    %c0_1 = arith.constant 0 : index
    %c0_2 = arith.constant 0 : index
    %1 = vector.load %arg3[%c0_1, %c0_2] : memref<32x128xf32, #tpu.memory_space<vmem>>, vector<32x128xf32>
    %cst = arith.constant dense<0.000000e+00> : vector<256x128xf32>
    %2 = tpu.matmul %0, %1, %cst {dimension_numbers = #tpu.dot_dimension_numbers<[1], [0], [0], [1], [0, 0, 1, 1], [], []>, precision = #tpu.contract_precision<fp32>} : vector<256x32xf32>, vector<32x128xf32>, vector<256x128xf32> -> vector<256x128xf32>
    %c0_3 = arith.constant 0 : index
    %c0_4 = arith.constant 0 : index
    %3 = vector.load %arg4[%c0_3, %c0_4] : memref<256x128xf32, #tpu.memory_space<vmem>>, vector<256x128xf32>
    tpu.vector_store %arg4[%c0_3, %c0_4], %2 {strides = array<i32>} : memref<256x128xf32, #tpu.memory_space<vmem>>, vector<256x128xf32>,
    return
  }
  func.func @transform_0(%arg0: i32, %arg1: i32) -> (i32, i32) {
    %c0_i32 = arith.constant 0 : i32
    %c0_i32_0 = arith.constant 0 : i32
    return %arg0, %c0_i32 : i32, i32
  }
  func.func @transform_1(%arg0: i32, %arg1: i32) -> (i32, i32) {
    %c0_i32 = arith.constant 0 : i32
    %c0_i32_0 = arith.constant 0 : i32
    %c0_i32_1 = arith.constant 0 : i32
    return %c0_i32, %c0_i32_0 : i32, i32
  }
  func.func @transform_2(%arg0: i32, %arg1: i32) -> (i32, i32) {
    %c0_i32 = arith.constant 0 : i32
    return %arg0, %arg1 : i32, i32
  }
}

</mosaic_0001>

<bundles_post_ra>
// kernel: tpu_custom_call.1
= control target key start
LH: loop header
LB: loop body
LE: loop exit
PB: predicated region body
PF: predicated region fallthrough
CT: control target
= control target key end

     0   :  { %vm48_vm0 = vcmask 261120   ;;  %s2200_s0 = inlined_call_operand.vmem [shape: f32[256,32], index: 0, kind: input, shape index: {}]   ;;  %s2201_s1 = inlined_call_operand.vmem [shape: f32[32,128], index: 1, kind: input, shape index: {}]   ;;  %s2202_s2 = inlined_call_operand.hbm [shape: f32[256,128], index: 2, kind: output, shape index: {}]  }
   0x1   :  { %v47_v0 = vld [vmem:[%s2201_s1 + $0x18] sm:$0xff]  ;;  %v46_v1 = vld [vmem:[%s2201_s1 + $0x10] sm:$0xff]  ;;  %v45_v2 = vld [vmem:[%s2201_s1 + $0x8] sm:$0xff] }
   0x2   :  { %v1405_v3 = vand.u32 4294901760, %v47_v0  ;;  %v1407_v4 = vand.u32 4294901760, %v46_v1  ;;  %v1409_v5 = vand.u32 4294901760, %v45_v2  ;;  %v44_v6 = vld [vmem:[%s2201_s1] sm:$0xff]  ;;  %v29_v8 = vld [vmem:[%s2200_s0 + $0x88] sm:$0xff]  ;;  %v30_v13 = vld [vmem:[%s2200_s0 + $0x90] sm:$0xff] }
   0x3   :  { %v28_v7 = vld [vmem:[%s2200_s0 + $0x80] sm:$0xff]  ;;  %v1420_v9 = vand.u32 4294901760, %v44_v6  ;;  %v101_v11 = vsel %vm48_vm0, %v29_v8, 0  ;;  %v104_v21 = vsel %vm48_vm0, %v30_v13, 0 }
   0x4   :  { %v98_v10 = vsel %vm48_vm0, %v28_v7, 0  ;;  %v12_v12 = vld [vmem:[%s2200_s0] sm:$0xff]  ;;  %1341 = vmatpush.msra.mxu2 %v1405_v3  ;;  %v435_v14 = vsub.f32 %v47_v0, %v1405_v3  ;;  %v441_v16 = vsub.f32 %v46_v1, %v1407_v4  ;;  %v447_v17 = vsub.f32 %v45_v2, %v1409_v5  ;;  %158 = vmatpush.msra.mxu0 %v1405_v3 }
   0x5   :  { %v1432_v15 = vand.u32 4294901760, %v98_v10  ;;  %v1438_v18 = vsub.f32 %v44_v6, %v1420_v9  ;;  %v1440_v19 = vand.u32 4294901760, %v101_v11  ;;  %v50_v20 = vsel %vm48_vm0, %v12_v12, 0 }
   0x6   :  { %7 = vsyncpa [#allocation3], 0  ;;  %1342 = vmatpush.msra.mxu2 %v1407_v4  ;;  %v436_v22 = vand.u32 4294901760, %v435_v14  ;;  %v442_v24 = vand.u32 4294901760, %v441_v16  ;;  %v448_v25 = vand.u32 4294901760, %v447_v17  ;;  %160 = vmatpush.msra.mxu0 %v1407_v4  ;;  %v1453_v28 = vand.u32 4294901760, %v50_v20 }
   0x7   :  { %v1446_v23 = vsub.f32 %v98_v10, %v1432_v15  ;;  %v454_v26 = vand.u32 4294901760, %v1438_v18  ;;  %v1451_v27 = vsub.f32 %v101_v11, %v1440_v19  ;;  %v1464_v35 = vand.u32 4294901760, %v104_v21  ;;  %v13_v36 = vld [vmem:[%s2200_s0 + $0x8] sm:$0xff]  ;;  %v14_v37 = vld [vmem:[%s2200_s0 + $0x10] sm:$0xff]  ;;  %v31_v46 = vld [vmem:[%s2200_s0 + $0x98] sm:$0xff]  ;;  %s1329_s25 = sshll.u32 %s2202_s2, 4  ;;  %s1330_s25 = int_to_ptr.hbm [resolvable:$true] %s1329_s25 }
   0x8   :  { %1343 = vmatpush.msra.mxu2 %v1409_v5  ;;  %v437_v29 = vsub.f32 %v435_v14, %v436_v22  ;;  %v443_v31 = vsub.f32 %v441_v16, %v442_v24  ;;  %v449_v32 = vsub.f32 %v447_v17, %v448_v25  ;;  %162 = vmatpush.msra.mxu0 %v1409_v5  ;;  %v53_v45 = vsel %vm48_vm0, %v13_v36, 0  ;;  %v15_v57 = vld [vmem:[%s2200_s0 + $0x18] sm:$0xff]  ;;  %v32_v1 = vld [vmem:[%s2200_s0 + $0xa0] sm:$0xff]  ;;  %s1379_s26 = smov 128   ;;  %s1380_s27 = smov 8  }
   0x9   :  { %v2211_v30 = vand.u32 4294901760, %v1446_v23  ;;  %v455_v33 = vsub.f32 %v1438_v18, %v454_v26  ;;  %v1462_v34 = vsub.f32 %v50_v20, %v1453_v28  ;;  %v2210_v41 = vand.u32 4294901760, %v1451_v27  ;;  %v16_v11 = vld [vmem:[%s2200_s0 + $0x20] sm:$0xff] }
   0xa   :  { %1344 = vmatpush.msra.mxu2 %v1420_v9  ;;  %v438_v38 = vand.u32 4294901760, %v437_v29  ;;  %v444_v40 = vand.u32 4294901760, %v443_v31  ;;  %164 = vmatpush.msra.mxu0 %v1420_v9  ;;  %v450_v44 = vand.u32 4294901760, %v449_v32  ;;  %v56_v47 = vsel %vm48_vm0, %v14_v37, 0  ;;  %v34_v37 = vld [vmem:[%s2200_s0 + $0xb0] sm:$0xff] }
   0xb   :  { %v296_v39 = vsub.f32 %v1446_v23, %v2211_v30  ;;  %v2225_v42 = vand.u32 4294901760, %v1462_v34  ;;  %v1487_v49 = vand.u32 4294901760, %v53_v45  ;;  %v456_v50 = vand.u32 4294901760, %v455_v33 }
   0xc   :  { %601 = vmatpush.msrb.mxu2 %v435_v14  ;;  %1000 = vmatpush.msrb.mxu0 %v436_v22  ;;  %v304_v51 = vsub.f32 %v1451_v27, %v2210_v41  ;;  %v1493_v52 = vsub.f32 %v104_v21, %v1464_v35  ;;  %v1495_v53 = vand.u32 4294901760, %v56_v47  ;;  %v107_v56 = vsel %vm48_vm0, %v31_v46, 0  ;;  %v18_v46 = vld [vmem:[%s2200_s0 + $0x30] sm:$0xff]  ;;  %v23_v41 = vld [vmem:[%s2200_s0 + $0x58] sm:$0xff] }
   0xd   :  { %1345 = vmatpush.msra.mxu3 %v438_v38  ;;  %v297_v43 = vand.u32 4294901760, %v296_v39  ;;  %439 = vmatpush.msra.mxu1 %v438_v38  ;;  %v168_v48 = vsub.f32 %v1462_v34, %v2225_v42  ;;  %v1498_v55 = vsub.f32 %v53_v45, %v1487_v49  ;;  %v1509_v62 = vand.u32 4294901760, %v107_v56 }
   0xe   :  { %604 = vmatpush.msrb.mxu2 %v441_v16  ;;  %1004 = vmatpush.msrb.mxu0 %v442_v24  ;;  %v1506_v59 = vsub.f32 %v56_v47, %v1495_v53  ;;  %v305_v60 = vand.u32 4294901760, %v304_v51  ;;  %v2209_v61 = vand.u32 4294901760, %v1493_v52  ;;  %v59_v63 = vsel %vm48_vm0, %v15_v57, 0  ;;  %v35_v57 = vld [vmem:[%s2200_s0 + $0xb8] sm:$0xff] }
   0xf   :  { %298 = vmatmul.f32.vlgmr.msra.gmra.mxu2 %v297_v43  ;;  %1346 = vmatpush.msra.mxu3 %v444_v40  ;;  %v169_v54 = vand.u32 4294901760, %v168_v48  ;;  %v2223_v58 = vand.u32 4294901760, %v1498_v55  ;;  %v1524_v7 = vand.u32 4294901760, %v59_v63  ;;  %v1532_v10 = vsub.f32 %v107_v56, %v1509_v62 }
  0x10   :  { %445 = vmatpush.msra.mxu1 %v444_v40  ;;  %607 = vmatpush.msrb.mxu2 %v447_v17  ;;  %v2222_v6 = vand.u32 4294901760, %v1506_v59  ;;  %v312_v8 = vsub.f32 %v1493_v52, %v2209_v61  ;;  %v116_v45 = vsel %vm48_vm0, %v34_v37, 0  ;;  %v68_v56 = vsel %vm48_vm0, %v18_v46, 0 }
  0x11   :  { %1347 = vmatpush.msra.mxu3 %v450_v44  ;;  %1008 = vmatpush.msrb.mxu0 %v448_v25  ;;  %v176_v0 = vsub.f32 %v1498_v55, %v2223_v58  ;;  %v1545_v13 = vsub.f32 %v59_v63, %v1524_v7  ;;  %v2208_v16 = vand.u32 4294901760, %v1532_v10  ;;  %v17_v25 = vld [vmem:[%s2200_s0 + $0x28] sm:$0xff] }
  0x12   :  { %451 = vmatpush.msra.mxu1 %v450_v44  ;;  %170 = vmatmul.f32.vlgmr.msra.gmra.mxu0 %v169_v54  ;;  %v184_v12 = vsub.f32 %v1506_v59, %v2222_v6  ;;  %v313_v14 = vand.u32 4294901760, %v312_v8  ;;  %v65_v36 = vsel %vm48_vm0, %v17_v25, 0  ;;  %v1607_v54 = vand.u32 4294901760, %v116_v45  ;;  %v25_v6 = vld [vmem:[%s2200_s0 + $0x68] sm:$0xff] }
  0x13   :  { %1348 = vmatpush.msra.mxu3 %v456_v50  ;;  %610 = vmatpush.msrb.mxu2 %v1438_v18  ;;  %v177_v2 = vand.u32 4294901760, %v176_v0  ;;  %v62_v18 = vsel %vm48_vm0, %v16_v11, 0  ;;  %v2221_v20 = vand.u32 4294901760, %v1545_v13  ;;  %v320_v22 = vsub.f32 %v1532_v10, %v2208_v16 }
  0x14   :  { %523 = vmatmul.f32.vlgmr.msra.gmra.mxu3 %v1432_v15  ;;  %457 = vmatpush.msra.mxu1 %v456_v50  ;;  %v1560_v21 = vand.u32 4294901760, %v62_v18  ;;  %v1588_v40 = vand.u32 4294901760, %v65_v36  ;;  %v1616_v0 = vand.u32 4294901760, %v68_v56  ;;  %v119_v8 = vsel %vm48_vm0, %v35_v57, 0  ;;  %v37_v57 = vld [vmem:[%s2200_s0 + $0xc8] sm:$0xff] }
  0x15   :  { %785 = vmatpush.msrb.mxu3 %v1405_v3  ;;  %459 = vmatmul.f32.vlgmr.msra.gmra.mxu1 %v1453_v28  ;;  %v321_v31 = vand.u32 4294901760, %v320_v22  ;;  %v36_v22 = vld [vmem:[%s2200_s0 + $0xc0] sm:$0xff] }
  0x16   :  { %1155 = vmatpush.msrb.mxu1 %v1405_v3  ;;  %1012 = vmatpush.msrb.mxu0 %v454_v26  ;;  %v110_v3 = vsel %vm48_vm0, %v32_v1, 0  ;;  %v192_v26 = vsub.f32 %v1545_v13, %v2221_v20  ;;  %v1576_v29 = vsub.f32 %v62_v18, %v1560_v21  ;;  %v1604_v48 = vsub.f32 %v65_v36, %v1588_v40 }
  0x17   :  { %306 = vmatmul.f32.gmra.mxu2 %v305_v60  ;;  %787 = vmatpush.msrb.mxu3 %v1407_v4  ;;  %v1549_v17 = vand.u32 4294901760, %v110_v3  ;;  %v122_v37 = vsel %vm48_vm0, %v36_v22, 0 }
  0x18   :  { %1157 = vmatpush.msrb.mxu1 %v1407_v4  ;;  %v33_v4 = vld [vmem:[%s2200_s0 + $0xa8] sm:$0xff]  ;;  %v193_v38 = vand.u32 4294901760, %v192_v26  ;;  %v2219_v39 = vand.u32 4294901760, %v1576_v29  ;;  %v2217_v63 = vand.u32 4294901760, %v1604_v48 }
  0x19   :  { %789 = vmatpush.msrb.mxu3 %v1409_v5  ;;  %v1566_v24 = vsub.f32 %v110_v3, %v1549_v17  ;;  %v19_v3 = vld [vmem:[%s2200_s0 + $0x38] sm:$0xff] }
  0x1a   :  { %178 = vmatmul.f32.gmra.mxu0 %v177_v2  ;;  %1159 = vmatpush.msrb.mxu1 %v1409_v5  ;;  %v185_v5 = vand.u32 4294901760, %v184_v12  ;;  %v200_v47 = vsub.f32 %v1576_v29, %v2219_v39  ;;  %v1622_v2 = vsub.f32 %v116_v45, %v1607_v54  ;;  %v208_v11 = vsub.f32 %v1604_v48, %v2217_v63 }
  0x1b   :  { %791 = vmatpush.msrb.mxu3 %v1420_v9  ;;  %v2207_v32 = vand.u32 4294901760, %v1566_v24  ;;  %v1632_v12 = vsub.f32 %v68_v56, %v1616_v0 }
  0x1c   :  { %527 = vmatmul.f32.gmra.mxu3 %v1440_v19  ;;  %1161 = vmatpush.msrb.mxu1 %v1420_v9  ;;  %v113_v9 = vsel %vm48_vm0, %v33_v4, 0  ;;  %v201_v60 = vand.u32 4294901760, %v200_v47  ;;  %v2204_v18 = vand.u32 4294901760, %v1622_v2  ;;  %v1635_v4 = vand.u32 4294901760, %v119_v8 }
  0x1d   :  { %463 = vmatmul.f32.gmra.mxu1 %v1487_v49  ;;  %v1579_v33 = vand.u32 4294901760, %v113_v9  ;;  %v328_v43 = vsub.f32 %v1566_v24, %v2207_v32  ;;  %v2216_v25 = vand.u32 4294901760, %v1632_v12 }
  0x1e   :  { %v1650_v36 = vsub.f32 %v119_v8, %v1635_v4 }
  0x1f   :  { %314 = vmatmul.f32.gmra.mxu2 %v313_v14  ;;  %v1594_v44 = vsub.f32 %v113_v9, %v1579_v33  ;;  %v329_v50 = vand.u32 4294901760, %v328_v43  ;;  %v209_v9 = vand.u32 4294901760, %v208_v11  ;;  %v216_v43 = vsub.f32 %v1632_v12, %v2216_v25  ;;  %v24_v25 = vld [vmem:[%s2200_s0 + $0x60] sm:$0xff] }
  0x20   :  { %v2203_v47 = vand.u32 4294901760, %v1650_v36 }
  0x21   :  { %v2205_v51 = vand.u32 4294901760, %v1594_v44 }
  0x22   :  { %186 = vmatmul.f32.gmra.mxu0 %v185_v5  ;;  %v71_v5 = vsel %vm48_vm0, %v19_v3, 0  ;;  %v352_v3 = vsub.f32 %v1650_v36, %v2203_v47 }
  0x23   :  { %v336_v1 = vsub.f32 %v1594_v44, %v2205_v51  ;;  %v1644_v26 = vand.u32 4294901760, %v71_v5 }
  0x24   :  { %531 = vmatmul.f32.gmra.mxu3 %v1464_v35 }
  0x25   :  { %467 = vmatmul.f32.gmra.mxu1 %v1495_v53  ;;  %v337_v14 = vand.u32 4294901760, %v336_v1  ;;  %v1660_v45 = vsub.f32 %v71_v5, %v1644_v26  ;;  %v21_v5 = vld [vmem:[%s2200_s0 + $0x48] sm:$0xff] }
  0x27   :  { %322 = vmatmul.f32.gmra.mxu2 %v321_v31  ;;  %v344_v31 = vsub.f32 %v1622_v2, %v2204_v18  ;;  %v2215_v1 = vand.u32 4294901760, %v1660_v45  ;;  %v22_v18 = vld [vmem:[%s2200_s0 + $0x50] sm:$0xff] }
  0x29   :  { %v345_v46 = vand.u32 4294901760, %v344_v31  ;;  %v224_v22 = vsub.f32 %v1660_v45, %v2215_v1  ;;  %v353_v31 = vand.u32 4294901760, %v352_v3 }
  0x2a   :  { %194 = vmatmul.f32.gmra.mxu0 %v193_v38  ;;  %v20_v38 = vld [vmem:[%s2200_s0 + $0x40] sm:$0xff] }
  0x2b   :  { %v74_v56 = vsel %vm48_vm0, %v20_v38, 0 }
  0x2c   :  { %535 = vmatmul.f32.gmra.mxu3 %v1509_v62  ;;  %v1672_v8 = vand.u32 4294901760, %v74_v56 }
  0x2d   :  { %471 = vmatmul.f32.gmra.mxu1 %v1524_v7 }
  0x2f   :  { %330 = vmatmul.f32.gmra.mxu2 %v329_v50  ;;  %v1663_v50 = vand.u32 4294901760, %v122_v37 }
  0x31   :  { %2257 = vst [vmem:[#allocation5_spill] sm:$0xff] %v1663_v50  ;;  %v1678_v11 = vsub.f32 %v122_v37, %v1663_v50  ;;  %v77_v37 = vsel %vm48_vm0, %v21_v5, 0 }
  0x32   :  { %202 = vmatmul.f32.gmra.mxu0 %v201_v60  ;;  %v217_v60 = vand.u32 4294901760, %v216_v43 }
  0x33   :  { %v2206_v38 = vand.u32 4294901760, %v1678_v11 }
  0x34   :  { %539 = vmatmul.f32.gmra.mxu3 %v1549_v17 }
  0x35   :  { %475 = vmatmul.f32.gmra.mxu1 %v1560_v21  ;;  %v360_v3 = vsub.f32 %v1678_v11, %v2206_v38 }
  0x37   :  { %338 = vmatmul.f32.gmra.mxu2 %v337_v14  ;;  %v125_v14 = vsel %vm48_vm0, %v37_v57, 0  ;;  %v225_v57 = vand.u32 4294901760, %v224_v22  ;;  %v361_v51 = vand.u32 4294901760, %v360_v3 }
  0x38   :  { %v1691_v43 = vand.u32 4294901760, %v125_v14 }
  0x3a   :  { %210 = vmatmul.f32.gmra.mxu0 %v209_v9  ;;  %v1688_v9 = vsub.f32 %v74_v56, %v1672_v8  ;;  %2258 = vst [vmem:[#allocation6_spill] sm:$0xff] %v1691_v43  ;;  %v1700_v56 = vand.u32 4294901760, %v77_v37  ;;  %v1706_v5 = vsub.f32 %v125_v14, %v1691_v43  ;;  %v80_v14 = vsel %vm48_vm0, %v22_v18, 0 }
  0x3c   :  { %543 = vmatmul.f32.gmra.mxu3 %v1579_v33  ;;  %2259 = vst [vmem:[#allocation7_spill] sm:$0xff] %v1706_v5  ;;  %v2212_v38 = vand.u32 4294901760, %v1706_v5 }
  0x3d   :  { %479 = vmatmul.f32.gmra.mxu1 %v1588_v40 }
  0x3e   :  { %v368_v3 = vsub.f32 %v1706_v5, %v2212_v38 }
  0x3f   :  { %346 = vmatmul.f32.gmra.mxu2 %v345_v46  ;;  %v38_v46 = vld [vmem:[%s2200_s0 + $0xd0] sm:$0xff] }
  0x40   :  { %v128_v47 = vsel %vm48_vm0, %v38_v46, 0  ;;  %v39_v46 = vld [vmem:[%s2200_s0 + $0xd8] sm:$0xff]  ;;  %v369_v30 = vand.u32 4294901760, %v368_v3 }
  0x41   :  { %v1719_v32 = vand.u32 4294901760, %v128_v47  ;;  %v131_v61 = vsel %vm48_vm0, %v39_v46, 0  ;;  %v40_v46 = vld [vmem:[%s2200_s0 + $0xe0] sm:$0xff] }
  0x42   :  { %218 = vmatmul.f32.gmra.mxu0 %v217_v60  ;;  %v2213_v60 = vand.u32 4294901760, %v1688_v9  ;;  %v134_v1 = vsel %vm48_vm0, %v40_v46, 0  ;;  %v41_v46 = vld [vmem:[%s2200_s0 + $0xe8] sm:$0xff] }
  0x43   :  { %2260 = vst [vmem:[#allocation8_spill] sm:$0xff] %v1719_v32  ;;  %v1734_v18 = vsub.f32 %v128_v47, %v1719_v32  ;;  %v83_v47 = vsel %vm48_vm0, %v23_v41, 0  ;;  %v1775_v39 = vand.u32 4294901760, %v134_v1  ;;  %v137_v20 = vsel %vm48_vm0, %v41_v46, 0  ;;  %v42_v46 = vld [vmem:[%s2200_s0 + $0xf0] sm:$0xff] }
  0x44   :  { %547 = vmatmul.f32.gmra.mxu3 %v1607_v54  ;;  %v232_v22 = vsub.f32 %v1688_v9, %v2213_v60  ;;  %v1747_v60 = vand.u32 4294901760, %v131_v61  ;;  %v1803_v42 = vand.u32 4294901760, %v137_v20 }
  0x45   :  { %483 = vmatmul.f32.gmra.mxu1 %v1616_v0  ;;  %2261 = vst [vmem:[#allocation9_spill] sm:$0xff] %v1734_v18  ;;  %v2218_v38 = vand.u32 4294901760, %v1734_v18 }
  0x46   :  { %2262 = vst [vmem:[#allocation10_spill] sm:$0xff] %v1747_v60  ;;  %v1762_v41 = vsub.f32 %v131_v61, %v1747_v60  ;;  %v86_v61 = vsel %vm48_vm0, %v24_v25, 0  ;;  %v1790_v25 = vsub.f32 %v134_v1, %v1775_v39  ;;  %v89_v1 = vsel %vm48_vm0, %v25_v6, 0 }
  0x47   :  { %354 = vmatmul.f32.gmra.mxu2 %v353_v31  ;;  %v1716_v31 = vsub.f32 %v77_v37, %v1700_v56  ;;  %v1728_v37 = vand.u32 4294901760, %v80_v14  ;;  %v376_v3 = vsub.f32 %v1734_v18, %v2218_v38  ;;  %2264 = vst [vmem:[#allocation12_spill] sm:$0xff] %v1775_v39  ;;  %v1818_v6 = vsub.f32 %v137_v20, %v1803_v42 }
  0x48   :  { %2263 = vst [vmem:[#allocation11_spill] sm:$0xff] %v1762_v41  ;;  %v2224_v38 = vand.u32 4294901760, %v1762_v41 }
  0x49   :  { %v2214_v16 = vand.u32 4294901760, %v1716_v31  ;;  %v377_v63 = vand.u32 4294901760, %v376_v3  ;;  %2265 = vst [vmem:[#allocation13_spill] sm:$0xff] %v1790_v25 }
  0x4a   :  { %226 = vmatmul.f32.gmra.mxu0 %v225_v57  ;;  %v233_v57 = vand.u32 4294901760, %v232_v22  ;;  %v384_v3 = vsub.f32 %v1762_v41, %v2224_v38  ;;  %v2233_v38 = vand.u32 4294901760, %v1790_v25  ;;  %2266 = vst [vmem:[#allocation14_spill] sm:$0xff] %v1818_v6  ;;  %v140_v41 = vsel %vm48_vm0, %v42_v46, 0  ;;  %v43_v46 = vld [vmem:[%s2200_s0 + $0xf8] sm:$0xff] }
  0x4b   :  { %v240_v22 = vsub.f32 %v1716_v31, %v2214_v16 }
  0x4c   :  { %551 = vmatmul.f32.gmra.mxu3 %v1635_v4  ;;  %v385_v58 = vand.u32 4294901760, %v384_v3  ;;  %v392_v3 = vsub.f32 %v1790_v25, %v2233_v38  ;;  %v2243_v38 = vand.u32 4294901760, %v1818_v6  ;;  %v1831_v25 = vand.u32 4294901760, %v140_v41 }
  0x4d   :  { %487 = vmatmul.f32.gmra.mxu1 %v1644_v26 }
  0x4e   :  { %v393_v18 = vand.u32 4294901760, %v392_v3  ;;  %v400_v3 = vsub.f32 %v1818_v6, %v2243_v38 }
  0x4f   :  { %362 = vmatmul.f32.gmra.mxu2 %v361_v51  ;;  %v1744_v51 = vsub.f32 %v80_v14, %v1728_v37  ;;  %v1756_v14 = vand.u32 4294901760, %v83_v47 }
  0x50   :  { %v401_v5 = vand.u32 4294901760, %v400_v3 }
  0x51   :  { %v2220_v16 = vand.u32 4294901760, %v1744_v51 }
  0x52   :  { %234 = vmatmul.f32.gmra.mxu0 %v233_v57  ;;  %v241_v57 = vand.u32 4294901760, %v240_v22 }
  0x53   :  { %v248_v22 = vsub.f32 %v1744_v51, %v2220_v16 }
  0x54   :  { %555 = vmatmul.f32.gmra.mxu3 %v1663_v50 }
  0x55   :  { %491 = vmatmul.f32.gmra.mxu1 %v1672_v8 }
  0x57   :  { %370 = vmatmul.f32.gmra.mxu2 %v369_v30  ;;  %v1772_v30 = vsub.f32 %v83_v47, %v1756_v14  ;;  %v1784_v47 = vand.u32 4294901760, %v86_v61 }
  0x59   :  { %v2226_v16 = vand.u32 4294901760, %v1772_v30 }
  0x5a   :  { %242 = vmatmul.f32.gmra.mxu0 %v241_v57  ;;  %v249_v57 = vand.u32 4294901760, %v248_v22 }
  0x5b   :  { %v256_v22 = vsub.f32 %v1772_v30, %v2226_v16 }
  0x5c   :  { %559 = vmatmul.f32.gmra.mxu3 %v1691_v43  ;;  %v27_v43 = vld [vmem:[%s2200_s0 + $0x78] sm:$0xff] }
  0x5d   :  { %495 = vmatmul.f32.gmra.mxu1 %v1700_v56 }
  0x5f   :  { %378 = vmatmul.f32.gmra.mxu2 %v377_v63  ;;  %v1800_v63 = vsub.f32 %v86_v61, %v1784_v47  ;;  %v1812_v61 = vand.u32 4294901760, %v89_v1 }
  0x61   :  { %v2236_v16 = vand.u32 4294901760, %v1800_v63 }
  0x62   :  { %250 = vmatmul.f32.gmra.mxu0 %v249_v57  ;;  %v257_v57 = vand.u32 4294901760, %v256_v22 }
  0x63   :  { %v264_v22 = vsub.f32 %v1800_v63, %v2236_v16 }
  0x64   :  { %563 = vmatmul.f32.gmra.mxu3 %v1719_v32  ;;  %v26_v32 = vld [vmem:[%s2200_s0 + $0x70] sm:$0xff]  ;;  %s1378_s0 = smov [#allocation2]  }
  0x65   :  { %499 = vmatmul.f32.gmra.mxu1 %v1728_v37  ;;  %v92_v20 = vsel %vm48_vm0, %v26_v32, 0  ;;  %v1846_v32 = vsub.f32 %v140_v41, %v1831_v25  ;;  %v95_v41 = vsel %vm48_vm0, %v27_v43, 0  ;;  %s1327_s23 = sshll.u32 %s1378_s0, 4  ;;  %s1328_s23 = int_to_ptr.vmem [resolvable:$true] %s1327_s23 }
  0x66   :  { %v1865_v50 = vand.u32 4294901760, %v95_v41 }
  0x67   :  { %386 = vmatmul.f32.gmra.mxu2 %v385_v58  ;;  %v1828_v58 = vsub.f32 %v89_v1, %v1812_v61  ;;  %v1840_v1 = vand.u32 4294901760, %v92_v20  ;;  %v2251_v38 = vand.u32 4294901760, %v1846_v32 }
  0x69   :  { %v2248_v16 = vand.u32 4294901760, %v1828_v58 }
  0x6a   :  { %258 = vmatmul.f32.gmra.mxu0 %v257_v57  ;;  %v265_v57 = vand.u32 4294901760, %v264_v22 }
  0x6b   :  { %v272_v22 = vsub.f32 %v1828_v58, %v2248_v16  ;;  %v1877_v16 = vsub.f32 %v95_v41, %v1865_v50 }
  0x6c   :  { %567 = vmatmul.f32.gmra.mxu3 %v1747_v60  ;;  %v143_v60 = vsel %vm48_vm0, %v43_v46, 0 }
  0x6d   :  { %503 = vmatmul.f32.gmra.mxu1 %v1756_v14  ;;  %v1859_v6 = vand.u32 4294901760, %v143_v60  ;;  %v273_v46 = vand.u32 4294901760, %v272_v22 }
  0x6f   :  { %394 = vmatmul.f32.gmra.mxu2 %v393_v18  ;;  %v1856_v18 = vsub.f32 %v92_v20, %v1840_v1  ;;  %2267 = vst [vmem:[#allocation15_spill] sm:$0xff] %v1859_v6  ;;  %v408_v20 = vsub.f32 %v1846_v32, %v2251_v38  ;;  %v1871_v3 = vsub.f32 %v143_v60, %v1859_v6  ;;  %v2253_v38 = vand.u32 4294901760, %v1877_v16 }
  0x71   :  { %v409_v22 = vand.u32 4294901760, %v408_v20  ;;  %v288_v41 = vsub.f32 %v1877_v16, %v2253_v38 }
  0x72   :  { %266 = vmatmul.f32.gmra.mxu0 %v265_v57  ;;  %v2254_v57 = vand.u32 4294901760, %v1856_v18 }
  0x73   :  { %v289_v20 = vand.u32 4294901760, %v288_v41 }
  0x74   :  { %571 = vmatmul.f32.gmra.mxu3 %v1775_v39  ;;  %v280_v43 = vsub.f32 %v1856_v18, %v2254_v57  ;;  %v2252_v39 = vand.u32 4294901760, %v1871_v3  ;;  %v2270_v57 = vand.u32 4294901760, %v1498_v55 }
  0x75   :  { %507 = vmatmul.f32.gmra.mxu1 %v1784_v47 }
  0x76   :  { %v416_v60 = vsub.f32 %v1871_v3, %v2252_v39 }
  0x77   :  { %402 = vmatmul.f32.gmra.mxu2 %v401_v5  ;;  %v281_v5 = vand.u32 4294901760, %v280_v43 }
  0x7a   :  { %274 = vmatmul.f32.gmra.mxu0 %v273_v46  ;;  %v417_v46 = vand.u32 4294901760, %v416_v60  ;;  %v2268_v60 = vand.u32 4294901760, %v1462_v34 }
  0x7c   :  { %575 = vmatmul.f32.gmra.mxu3 %v1803_v42 }
  0x7d   :  { %511 = vmatmul.f32.gmra.mxu1 %v1812_v61 }
  0x7f   :  { %410 = vmatmul.f32.gmra.mxu2 %v409_v22 }
  0x82   :  { %282 = vmatmul.f32.gmra.mxu0 %v281_v5 }
  0x84   :  { %579 = vmatmul.f32.gmra.mxu3 %v1831_v25 }
  0x85   :  { %515 = vmatmul.f32.gmra.mxu1 %v1840_v1 }
  0x87   :  { %418 = vmatmul.f32.gmra.mxu2 %v417_v46 }
  0x8a   :  { %290 = vmatmul.f32.gmra.mxu0 %v289_v20 }
  0x8c   :  { %583 = vmatmul.f32.gmra.mxu3 %v1859_v6 }
  0x8d   :  { %519 = vmatmul.f32.gmra.mxu1 %v1865_v50 }
  0x8f   :  { %613 = vmatmul.f32.vlgmr.msrb.gmra.mxu2 %v1462_v34  ;;  %v1894_v43 = vpop.f32.mrf.mxu0 }
  0x92   :  { %v299_v22 = vpop.f32.mrf.mxu2  ;;  %v1896_v5 = vpop.f32.mrf.mxu1  ;;  %1014 = vmatmul.f32.vlgmr.msrb.gmra.mxu0 %v1453_v28 }
  0x94   :  { %795 = vmatmul.f32.vlgmr.msrb.gmra.mxu3 %v2268_v60 }
  0x95   :  { %1163 = vmatmul.f32.vlgmr.msrb.gmra.mxu1 %v1453_v28 }
  0x97   :  { %618 = vmatmul.f32.gmra.mxu2 %v1498_v55  ;;  %v524_v41 = vpop.f32.mrf.mxu3  ;;  %v1903_v46 = vpop.f32.mrf.mxu0 }
  0x98   :  { %v1905_v20 = vadd.f32 %v524_v41, %v299_v22  ;;  %v2272_v41 = vand.u32 4294901760, %v1506_v59 }
  0x9a   :  { %2269 = vst [vmem:[#allocation16_spill] sm:$0xff] %v1905_v20  ;;  %v307_v39 = vpop.f32.mrf.mxu2  ;;  %v1907_v38 = vpop.f32.mrf.mxu1  ;;  %1018 = vmatmul.f32.gmra.mxu0 %v1487_v49 }
  0x9c   :  { %801 = vmatmul.f32.gmra.mxu3 %v2270_v57 }
  0x9d   :  { %1167 = vmatmul.f32.gmra.mxu1 %v1487_v49 }
  0x9f   :  { %623 = vmatmul.f32.gmra.mxu2 %v1506_v59  ;;  %v528_v28 = vpop.f32.mrf.mxu3  ;;  %v1914_v34 = vpop.f32.mrf.mxu0 }
  0xa0   :  { %v1916_v60 = vadd.f32 %v528_v28, %v307_v39  ;;  %v2274_v28 = vand.u32 4294901760, %v1545_v13 }
  0xa2   :  { %2271 = vst [vmem:[#allocation17_spill] sm:$0xff] %v1916_v60  ;;  %v315_v6 = vpop.f32.mrf.mxu2  ;;  %v1918_v22 = vpop.f32.mrf.mxu1  ;;  %1022 = vmatmul.f32.gmra.mxu0 %v1495_v53 }
  0xa4   :  { %807 = vmatmul.f32.gmra.mxu3 %v2272_v41 }
  0xa5   :  { %1171 = vmatmul.f32.gmra.mxu1 %v1495_v53 }
  0xa7   :  { %628 = vmatmul.f32.gmra.mxu2 %v1545_v13  ;;  %v532_v49 = vpop.f32.mrf.mxu3  ;;  %v1925_v55 = vpop.f32.mrf.mxu0 }
  0xa8   :  { %v1927_v57 = vadd.f32 %v532_v49, %v315_v6  ;;  %v2276_v49 = vand.u32 4294901760, %v1576_v29 }
  0xaa   :  { %2273 = vst [vmem:[#allocation18_spill] sm:$0xff] %v1927_v57  ;;  %v323_v20 = vpop.f32.mrf.mxu2  ;;  %v1929_v39 = vpop.f32.mrf.mxu1  ;;  %1026 = vmatmul.f32.gmra.mxu0 %v1524_v7 }
  0xac   :  { %813 = vmatmul.f32.gmra.mxu3 %v2274_v28 }
  0xad   :  { %1175 = vmatmul.f32.gmra.mxu1 %v1524_v7 }
  0xaf   :  { %633 = vmatmul.f32.gmra.mxu2 %v1576_v29  ;;  %v536_v53 = vpop.f32.mrf.mxu3  ;;  %v1936_v59 = vpop.f32.mrf.mxu0 }
  0xb0   :  { %v1938_v41 = vadd.f32 %v536_v53, %v323_v20  ;;  %v2278_v53 = vand.u32 4294901760, %v1604_v48 }
  0xb2   :  { %2275 = vst [vmem:[#allocation19_spill] sm:$0xff] %v1938_v41  ;;  %v331_v60 = vpop.f32.mrf.mxu2  ;;  %v1940_v6 = vpop.f32.mrf.mxu1  ;;  %1030 = vmatmul.f32.gmra.mxu0 %v1560_v21 }
  0xb4   :  { %819 = vmatmul.f32.gmra.mxu3 %v2276_v49 }
  0xb5   :  { %1179 = vmatmul.f32.gmra.mxu1 %v1560_v21 }
  0xb7   :  { %638 = vmatmul.f32.gmra.mxu2 %v1604_v48  ;;  %v540_v7 = vpop.f32.mrf.mxu3  ;;  %v1947_v13 = vpop.f32.mrf.mxu0 }
  0xb8   :  { %v1949_v28 = vadd.f32 %v540_v7, %v331_v60  ;;  %v2280_v7 = vand.u32 4294901760, %v1632_v12 }
  0xba   :  { %2277 = vst [vmem:[#allocation20_spill] sm:$0xff] %v1949_v28  ;;  %v339_v57 = vpop.f32.mrf.mxu2  ;;  %v1951_v20 = vpop.f32.mrf.mxu1  ;;  %1034 = vmatmul.f32.gmra.mxu0 %v1588_v40 }
  0xbc   :  { %825 = vmatmul.f32.gmra.mxu3 %v2278_v53 }
  0xbd   :  { %1183 = vmatmul.f32.gmra.mxu1 %v1588_v40 }
  0xbf   :  { %643 = vmatmul.f32.gmra.mxu2 %v1632_v12  ;;  %v544_v21 = vpop.f32.mrf.mxu3  ;;  %v1958_v29 = vpop.f32.mrf.mxu0 }
  0xc0   :  { %v1960_v49 = vadd.f32 %v544_v21, %v339_v57  ;;  %v2282_v21 = vand.u32 4294901760, %v1660_v45 }
  0xc2   :  { %2279 = vst [vmem:[#allocation21_spill] sm:$0xff] %v1960_v49  ;;  %v347_v41 = vpop.f32.mrf.mxu2  ;;  %v1962_v60 = vpop.f32.mrf.mxu1  ;;  %1038 = vmatmul.f32.gmra.mxu0 %v1616_v0 }
  0xc4   :  { %831 = vmatmul.f32.gmra.mxu3 %v2280_v7 }
  0xc5   :  { %1187 = vmatmul.f32.gmra.mxu1 %v1616_v0 }
  0xc7   :  { %648 = vmatmul.f32.gmra.mxu2 %v1660_v45  ;;  %v548_v40 = vpop.f32.mrf.mxu3  ;;  %v1969_v48 = vpop.f32.mrf.mxu0 }
  0xc8   :  { %v1971_v53 = vadd.f32 %v548_v40, %v347_v41  ;;  %v2284_v40 = vand.u32 4294901760, %v1688_v9 }
  0xca   :  { %2281 = vst [vmem:[#allocation22_spill] sm:$0xff] %v1971_v53  ;;  %v355_v28 = vpop.f32.mrf.mxu2  ;;  %v1973_v57 = vpop.f32.mrf.mxu1  ;;  %1042 = vmatmul.f32.gmra.mxu0 %v1644_v26 }
  0xcc   :  { %837 = vmatmul.f32.gmra.mxu3 %v2282_v21 }
  0xcd   :  { %1191 = vmatmul.f32.gmra.mxu1 %v1644_v26 }
  0xcf   :  { %653 = vmatmul.f32.gmra.mxu2 %v1688_v9  ;;  %v552_v0 = vpop.f32.mrf.mxu3  ;;  %v1980_v12 = vpop.f32.mrf.mxu0 }
  0xd0   :  { %v1982_v7 = vadd.f32 %v552_v0, %v355_v28  ;;  %v2286_v0 = vand.u32 4294901760, %v1716_v31 }
  0xd2   :  { %2283 = vst [vmem:[#allocation23_spill] sm:$0xff] %v1982_v7  ;;  %v363_v49 = vpop.f32.mrf.mxu2  ;;  %v1984_v41 = vpop.f32.mrf.mxu1  ;;  %1046 = vmatmul.f32.gmra.mxu0 %v1672_v8 }
  0xd4   :  { %843 = vmatmul.f32.gmra.mxu3 %v2284_v40 }
  0xd5   :  { %1195 = vmatmul.f32.gmra.mxu1 %v1672_v8 }
  0xd7   :  { %658 = vmatmul.f32.gmra.mxu2 %v1716_v31  ;;  %v556_v26 = vpop.f32.mrf.mxu3  ;;  %v1991_v45 = vpop.f32.mrf.mxu0 }
  0xd8   :  { %v1993_v21 = vadd.f32 %v556_v26, %v363_v49  ;;  %v2288_v26 = vand.u32 4294901760, %v1744_v51 }
  0xda   :  { %2285 = vst [vmem:[#allocation24_spill] sm:$0xff] %v1993_v21  ;;  %v371_v53 = vpop.f32.mrf.mxu2  ;;  %v1995_v28 = vpop.f32.mrf.mxu1  ;;  %1050 = vmatmul.f32.gmra.mxu0 %v1700_v56 }
  0xdc   :  { %849 = vmatmul.f32.gmra.mxu3 %v2286_v0 }
  0xdd   :  { %1199 = vmatmul.f32.gmra.mxu1 %v1700_v56 }
  0xdf   :  { %663 = vmatmul.f32.gmra.mxu2 %v1744_v51  ;;  %v560_v8 = vpop.f32.mrf.mxu3  ;;  %v2002_v9 = vpop.f32.mrf.mxu0 }
  0xe0   :  { %v2004_v40 = vadd.f32 %v560_v8, %v371_v53  ;;  %v2290_v8 = vand.u32 4294901760, %v1772_v30 }
  0xe2   :  { %2287 = vst [vmem:[#allocation25_spill] sm:$0xff] %v2004_v40  ;;  %v379_v7 = vpop.f32.mrf.mxu2  ;;  %v2006_v49 = vpop.f32.mrf.mxu1  ;;  %1054 = vmatmul.f32.gmra.mxu0 %v1728_v37 }
  0xe4   :  { %855 = vmatmul.f32.gmra.mxu3 %v2288_v26 }
  0xe5   :  { %1203 = vmatmul.f32.gmra.mxu1 %v1728_v37 }
  0xe7   :  { %668 = vmatmul.f32.gmra.mxu2 %v1772_v30  ;;  %v564_v56 = vpop.f32.mrf.mxu3  ;;  %v2013_v31 = vpop.f32.mrf.mxu0 }
  0xe8   :  { %v2015_v0 = vadd.f32 %v564_v56, %v379_v7  ;;  %v2292_v56 = vand.u32 4294901760, %v1800_v63 }
  0xea   :  { %2289 = vst [vmem:[#allocation26_spill] sm:$0xff] %v2015_v0  ;;  %v387_v21 = vpop.f32.mrf.mxu2  ;;  %v2017_v53 = vpop.f32.mrf.mxu1  ;;  %1058 = vmatmul.f32.gmra.mxu0 %v1756_v14 }
  0xec   :  { %861 = vmatmul.f32.gmra.mxu3 %v2290_v8 }
  0xed   :  { %1207 = vmatmul.f32.gmra.mxu1 %v1756_v14 }
  0xef   :  { %673 = vmatmul.f32.gmra.mxu2 %v1800_v63  ;;  %v568_v37 = vpop.f32.mrf.mxu3  ;;  %v2024_v51 = vpop.f32.mrf.mxu0 }
  0xf0   :  { %v2026_v26 = vadd.f32 %v568_v37, %v387_v21  ;;  %v2294_v37 = vand.u32 4294901760, %v1828_v58 }
  0xf2   :  { %2291 = vst [vmem:[#allocation27_spill] sm:$0xff] %v2026_v26  ;;  %v395_v40 = vpop.f32.mrf.mxu2  ;;  %v2028_v7 = vpop.f32.mrf.mxu1  ;;  %1062 = vmatmul.f32.gmra.mxu0 %v1784_v47 }
  0xf4   :  { %867 = vmatmul.f32.gmra.mxu3 %v2292_v56 }
  0xf5   :  { %1211 = vmatmul.f32.gmra.mxu1 %v1784_v47 }
  0xf7   :  { %678 = vmatmul.f32.gmra.mxu2 %v1828_v58  ;;  %v572_v14 = vpop.f32.mrf.mxu3  ;;  %v2035_v30 = vpop.f32.mrf.mxu0 }
  0xf8   :  { %v2037_v8 = vadd.f32 %v572_v14, %v395_v40  ;;  %v2296_v14 = vand.u32 4294901760, %v1856_v18 }
  0xfa   :  { %2293 = vst [vmem:[#allocation28_spill] sm:$0xff] %v2037_v8  ;;  %v403_v0 = vpop.f32.mrf.mxu2  ;;  %v2039_v21 = vpop.f32.mrf.mxu1  ;;  %1066 = vmatmul.f32.gmra.mxu0 %v1812_v61 }
  0xfc   :  { %873 = vmatmul.f32.gmra.mxu3 %v2294_v37 }
  0xfd   :  { %1215 = vmatmul.f32.gmra.mxu1 %v1812_v61 }
  0xff   :  { %683 = vmatmul.f32.gmra.mxu2 %v1856_v18  ;;  %v576_v47 = vpop.f32.mrf.mxu3  ;;  %v2046_v63 = vpop.f32.mrf.mxu0 }
 0x100   :  { %v2048_v56 = vadd.f32 %v576_v47, %v403_v0  ;;  %v2300_v47 = vand.u32 4294901760, %v1877_v16 }
 0x102   :  { %2295 = vst [vmem:[#allocation29_spill] sm:$0xff] %v2048_v56  ;;  %v411_v26 = vpop.f32.mrf.mxu2  ;;  %v2050_v40 = vpop.f32.mrf.mxu1  ;;  %1070 = vmatmul.f32.gmra.mxu0 %v1840_v1 }
 0x104   :  { %879 = vmatmul.f32.gmra.mxu3 %v2296_v14 }
 0x105   :  { %1219 = vmatmul.f32.gmra.mxu1 %v1840_v1 }
 0x107   :  { %688 = vmatmul.f32.gmra.mxu2 %v1877_v16  ;;  %v580_v61 = vpop.f32.mrf.mxu3  ;;  %v2057_v58 = vpop.f32.mrf.mxu0 }
 0x108   :  { %2297 = vst [vmem:[#allocation30_spill] sm:$0xff] %v2057_v58  ;;  %v2059_v37 = vadd.f32 %v580_v61, %v411_v26  ;;  %v461_v26 = vadd.f32 %v1896_v5, %v1894_v43  ;;  %v2302_v61 = vand.u32 4294901760, %v1446_v23 }
 0x10a   :  { %2298 = vst [vmem:[#allocation31_spill] sm:$0xff] %v2059_v37  ;;  %v419_v8 = vpop.f32.mrf.mxu2  ;;  %v2061_v0 = vpop.f32.mrf.mxu1  ;;  %1074 = vmatmul.f32.gmra.mxu0 %v1865_v50 }
 0x10b   :  { %2299 = vst [vmem:[#allocation32_spill] sm:$0xff] %v2061_v0  ;;  %v465_v0 = vadd.f32 %v1907_v38, %v1903_v46  ;;  %v469_v38 = vadd.f32 %v1918_v22, %v1914_v34  ;;  %v473_v34 = vadd.f32 %v1929_v39, %v1925_v55  ;;  %v477_v55 = vadd.f32 %v1940_v6, %v1936_v59 }
 0x10c   :  { %885 = vmatmul.f32.gmra.mxu3 %v2300_v47  ;;  %v481_v59 = vadd.f32 %v1951_v20, %v1947_v13  ;;  %v485_v13 = vadd.f32 %v1962_v60, %v1958_v29  ;;  %v489_v29 = vadd.f32 %v1973_v57, %v1969_v48  ;;  %v493_v48 = vadd.f32 %v1984_v41, %v1980_v12 }
 0x10d   :  { %1223 = vmatmul.f32.gmra.mxu1 %v1865_v50  ;;  %v497_v12 = vadd.f32 %v1995_v28, %v1991_v45  ;;  %v501_v45 = vadd.f32 %v2006_v49, %v2002_v9  ;;  %v505_v9 = vadd.f32 %v2017_v53, %v2013_v31  ;;  %v509_v31 = vadd.f32 %v2028_v7, %v2024_v51 }
 0x10e   :  { %v513_v51 = vadd.f32 %v2039_v21, %v2035_v30  ;;  %v517_v30 = vadd.f32 %v2050_v40, %v2046_v63 }
 0x10f   :  { %693 = vmatmul.f32.gmra.mxu2 %v1446_v23  ;;  %v584_v1 = vpop.f32.mrf.mxu3  ;;  %v1015_v18 = vpop.f32.mrf.mxu0  ;;  %v2303_v23 = vand.u32 4294901760, %v1451_v27 }
 0x110   :  { %v2068_v14 = vadd.f32 %v584_v1, %v419_v8 }
 0x112   :  { %2301 = vst [vmem:[#allocation33_spill] sm:$0xff] %v2068_v14  ;;  %v614_v56 = vpop.f32.mrf.mxu2  ;;  %v1164_v58 = vpop.f32.mrf.mxu1  ;;  %1078 = vmatmul.f32.gmra.mxu0 %v1432_v15  ;;  %v2329_v63 = vld [vmem:[#allocation32_spill] sm:$0xff] }
 0x113   :  { %v615_v16 = vadd.f32 %v614_v56, %v461_v26 }
 0x114   :  { %891 = vmatmul.f32.gmra.mxu3 %v2302_v61 }
 0x115   :  { %1227 = vmatmul.f32.gmra.mxu1 %v1432_v15 }
 0x117   :  { %698 = vmatmul.f32.gmra.mxu2 %v1451_v27  ;;  %v796_v50 = vpop.f32.mrf.mxu3  ;;  %v1019_v47 = vpop.f32.mrf.mxu0  ;;  %v2304_v27 = vand.u32 4294901760, %v1493_v52 }
 0x118   :  { %v797_v37 = vadd.f32 %v796_v50, %v615_v16 }
 0x11a   :  { %v619_v8 = vpop.f32.mrf.mxu2  ;;  %v1016_v1 = vadd.f32 %v1015_v18, %v797_v37  ;;  %v1168_v14 = vpop.f32.mrf.mxu1  ;;  %1082 = vmatmul.f32.gmra.mxu0 %v1440_v19 }
 0x11b   :  { %v620_v15 = vadd.f32 %v619_v8, %v465_v0 }
 0x11c   :  { %v1165_v43 = vadd.f32 %v1164_v58, %v1016_v1  ;;  %897 = vmatmul.f32.gmra.mxu3 %v2303_v23 }
 0x11d   :  { %1231 = vmatmul.f32.gmra.mxu1 %v1440_v19 }
 0x11e   :  { %1291 = vst [vmem:[#allocation2] sm:$0xff] %v1165_v43 }
 0x11f   :  { %703 = vmatmul.f32.gmra.mxu2 %v1493_v52  ;;  %v802_v5 = vpop.f32.mrf.mxu3  ;;  %v1023_v56 = vpop.f32.mrf.mxu0  ;;  %v2305_v52 = vand.u32 4294901760, %v1532_v10 }
 0x120   :  { %v803_v26 = vadd.f32 %v802_v5, %v620_v15 }
 0x122   :  { %v624_v37 = vpop.f32.mrf.mxu2  ;;  %v1020_v18 = vadd.f32 %v1019_v47, %v803_v26  ;;  %v1172_v61 = vpop.f32.mrf.mxu1  ;;  %1086 = vmatmul.f32.gmra.mxu0 %v1464_v35 }
 0x123   :  { %v625_v19 = vadd.f32 %v624_v37, %v469_v38 }
 0x124   :  { %v1169_v46 = vadd.f32 %v1168_v14, %v1020_v18  ;;  %903 = vmatmul.f32.gmra.mxu3 %v2304_v27 }
 0x125   :  { %1235 = vmatmul.f32.gmra.mxu1 %v1464_v35 }
 0x126   :  { %1292 = vst [vmem:[#allocation2 + $0x8] sm:$0xff] %v1169_v46 }
 0x127   :  { %708 = vmatmul.f32.gmra.mxu2 %v1532_v10  ;;  %v808_v58 = vpop.f32.mrf.mxu3  ;;  %v1027_v0 = vpop.f32.mrf.mxu0  ;;  %v2306_v10 = vand.u32 4294901760, %v1566_v24 }
 0x128   :  { %v809_v16 = vadd.f32 %v808_v58, %v625_v19 }
 0x12a   :  { %v629_v50 = vpop.f32.mrf.mxu2  ;;  %v1024_v47 = vadd.f32 %v1023_v56, %v809_v16  ;;  %v1176_v8 = vpop.f32.mrf.mxu1  ;;  %1090 = vmatmul.f32.gmra.mxu0 %v1509_v62 }
 0x12b   :  { %v630_v35 = vadd.f32 %v629_v50, %v473_v34 }
 0x12c   :  { %v1173_v22 = vadd.f32 %v1172_v61, %v1024_v47  ;;  %909 = vmatmul.f32.gmra.mxu3 %v2305_v52 }
 0x12d   :  { %1239 = vmatmul.f32.gmra.mxu1 %v1509_v62 }
 0x12e   :  { %1293 = vst [vmem:[#allocation2 + $0x10] sm:$0xff] %v1173_v22 }
 0x12f   :  { %713 = vmatmul.f32.gmra.mxu2 %v1566_v24  ;;  %v814_v14 = vpop.f32.mrf.mxu3  ;;  %v1031_v1 = vpop.f32.mrf.mxu0  ;;  %v2307_v24 = vand.u32 4294901760, %v1594_v44 }
 0x130   :  { %v815_v43 = vadd.f32 %v814_v14, %v630_v35 }
 0x132   :  { %v634_v23 = vpop.f32.mrf.mxu2  ;;  %v1028_v15 = vadd.f32 %v1027_v0, %v815_v43  ;;  %v1180_v5 = vpop.f32.mrf.mxu1  ;;  %1094 = vmatmul.f32.gmra.mxu0 %v1549_v17 }
 0x133   :  { %v635_v62 = vadd.f32 %v634_v23, %v477_v55  ;;  %v2312_v55 = vld [vmem:[#allocation7_spill] sm:$0xff] }
 0x134   :  { %v1177_v39 = vadd.f32 %v1176_v8, %v1028_v15  ;;  %915 = vmatmul.f32.gmra.mxu3 %v2306_v10 }
 0x135   :  { %1243 = vmatmul.f32.gmra.mxu1 %v1549_v17 }
 0x136   :  { %1294 = vst [vmem:[#allocation2 + $0x18] sm:$0xff] %v1177_v39 }
 0x137   :  { %718 = vmatmul.f32.gmra.mxu2 %v1594_v44  ;;  %v820_v56 = vpop.f32.mrf.mxu3  ;;  %v1035_v26 = vpop.f32.mrf.mxu0  ;;  %v2308_v44 = vand.u32 4294901760, %v1622_v2 }
 0x138   :  { %v821_v37 = vadd.f32 %v820_v56, %v635_v62 }
 0x13a   :  { %v639_v18 = vpop.f32.mrf.mxu2  ;;  %v1032_v61 = vadd.f32 %v1031_v1, %v821_v37  ;;  %v1184_v38 = vpop.f32.mrf.mxu1  ;;  %1098 = vmatmul.f32.gmra.mxu0 %v1579_v33 }
 0x13b   :  { %v640_v17 = vadd.f32 %v639_v18, %v481_v59  ;;  %v2313_v18 = vld [vmem:[#allocation6_spill] sm:$0xff] }
 0x13c   :  { %v1181_v6 = vadd.f32 %v1180_v5, %v1032_v61  ;;  %921 = vmatmul.f32.gmra.mxu3 %v2307_v24  ;;  %v2310_v5 = vld [vmem:[#allocation5_spill] sm:$0xff] }
 0x13d   :  { %1247 = vmatmul.f32.gmra.mxu1 %v1579_v33 }
 0x13e   :  { %1295 = vst [vmem:[#allocation2 + $0x20] sm:$0xff] %v1181_v6 }
 0x13f   :  { %723 = vmatmul.f32.gmra.mxu2 %v1622_v2  ;;  %v826_v46 = vpop.f32.mrf.mxu3  ;;  %v1039_v27 = vpop.f32.mrf.mxu0  ;;  %v2309_v2 = vand.u32 4294901760, %v1650_v36 }
 0x140   :  { %v827_v19 = vadd.f32 %v826_v46, %v640_v17 }
 0x142   :  { %v644_v58 = vpop.f32.mrf.mxu2  ;;  %v1036_v0 = vadd.f32 %v1035_v26, %v827_v19  ;;  %v1188_v16 = vpop.f32.mrf.mxu1  ;;  %1102 = vmatmul.f32.gmra.mxu0 %v1607_v54  ;;  %v2316_v19 = vld [vmem:[#allocation8_spill] sm:$0xff] }
 0x143   :  { %v645_v33 = vadd.f32 %v644_v58, %v485_v13 }
 0x144   :  { %v1185_v20 = vadd.f32 %v1184_v38, %v1036_v0  ;;  %927 = vmatmul.f32.gmra.mxu3 %v2308_v44  ;;  %v2315_v38 = vld [vmem:[#allocation9_spill] sm:$0xff] }
 0x145   :  { %1251 = vmatmul.f32.gmra.mxu1 %v1607_v54  ;;  %v2317_v58 = vand.u32 4294901760, %v2315_v38 }
 0x146   :  { %1296 = vst [vmem:[#allocation2 + $0x28] sm:$0xff] %v1185_v20 }
 0x147   :  { %728 = vmatmul.f32.gmra.mxu2 %v1650_v36  ;;  %v832_v50 = vpop.f32.mrf.mxu3  ;;  %v1043_v47 = vpop.f32.mrf.mxu0  ;;  %v2311_v36 = vand.u32 4294901760, %v1678_v11 }
 0x148   :  { %v833_v8 = vadd.f32 %v832_v50, %v645_v33 }
 0x14a   :  { %v649_v34 = vpop.f32.mrf.mxu2  ;;  %v1040_v22 = vadd.f32 %v1039_v27, %v833_v8  ;;  %v1192_v52 = vpop.f32.mrf.mxu1  ;;  %1106 = vmatmul.f32.gmra.mxu0 %v1635_v4  ;;  %v2319_v8 = vld [vmem:[#allocation10_spill] sm:$0xff] }
 0x14b   :  { %v650_v54 = vadd.f32 %v649_v34, %v489_v29 }
 0x14c   :  { %v1189_v60 = vadd.f32 %v1188_v16, %v1040_v22  ;;  %933 = vmatmul.f32.gmra.mxu3 %v2309_v2  ;;  %v2318_v16 = vld [vmem:[#allocation11_spill] sm:$0xff] }
 0x14d   :  { %1255 = vmatmul.f32.gmra.mxu1 %v1635_v4  ;;  %v2320_v34 = vand.u32 4294901760, %v2318_v16 }
 0x14e   :  { %1297 = vst [vmem:[#allocation2 + $0x30] sm:$0xff] %v1189_v60 }
 0x14f   :  { %733 = vmatmul.f32.gmra.mxu2 %v1678_v11  ;;  %v838_v35 = vpop.f32.mrf.mxu3  ;;  %v1047_v14 = vpop.f32.mrf.mxu0  ;;  %v2314_v11 = vand.u32 4294901760, %v2312_v55 }
 0x150   :  { %v839_v1 = vadd.f32 %v838_v35, %v650_v54 }
 0x152   :  { %v654_v43 = vpop.f32.mrf.mxu2  ;;  %v1044_v23 = vadd.f32 %v1043_v47, %v839_v1  ;;  %v1196_v15 = vpop.f32.mrf.mxu1  ;;  %1110 = vmatmul.f32.gmra.mxu0 %v2310_v5  ;;  %v2322_v1 = vld [vmem:[#allocation12_spill] sm:$0xff] }
 0x153   :  { %v655_v4 = vadd.f32 %v654_v43, %v493_v48 }
 0x154   :  { %v1193_v57 = vadd.f32 %v1192_v52, %v1044_v23  ;;  %939 = vmatmul.f32.gmra.mxu3 %v2311_v36  ;;  %v2321_v52 = vld [vmem:[#allocation13_spill] sm:$0xff] }
 0x155   :  { %1259 = vmatmul.f32.gmra.mxu1 %v2310_v5  ;;  %v2323_v43 = vand.u32 4294901760, %v2321_v52 }
 0x156   :  { %1298 = vst [vmem:[#allocation2 + $0x38] sm:$0xff] %v1193_v57 }
 0x157   :  { %738 = vmatmul.f32.gmra.mxu2 %v2312_v55  ;;  %v844_v39 = vpop.f32.mrf.mxu3  ;;  %v1051_v10 = vpop.f32.mrf.mxu0 }
 0x158   :  { %v845_v62 = vadd.f32 %v844_v39, %v655_v4 }
 0x15a   :  { %v659_v56 = vpop.f32.mrf.mxu2  ;;  %v1048_v26 = vadd.f32 %v1047_v14, %v845_v62  ;;  %v1200_v37 = vpop.f32.mrf.mxu1  ;;  %1114 = vmatmul.f32.gmra.mxu0 %v2313_v18 }
 0x15b   :  { %v660_v61 = vadd.f32 %v659_v56, %v497_v12 }
 0x15c   :  { %v1197_v41 = vadd.f32 %v1196_v15, %v1048_v26  ;;  %945 = vmatmul.f32.gmra.mxu3 %v2314_v11  ;;  %v2324_v15 = vld [vmem:[#allocation14_spill] sm:$0xff] }
 0x15d   :  { %1263 = vmatmul.f32.gmra.mxu1 %v2313_v18  ;;  %v2325_v39 = vand.u32 4294901760, %v2324_v15 }
 0x15e   :  { %1299 = vst [vmem:[#allocation2 + $0x40] sm:$0xff] %v1197_v41  ;;  %v2326_v41 = vand.u32 4294901760, %v1846_v32 }
 0x15f   :  { %743 = vmatmul.f32.gmra.mxu2 %v2315_v38  ;;  %v850_v59 = vpop.f32.mrf.mxu3  ;;  %v1055_v6 = vpop.f32.mrf.mxu0 }
 0x160   :  { %v851_v24 = vadd.f32 %v850_v59, %v660_v61 }
 0x162   :  { %v664_v17 = vpop.f32.mrf.mxu2  ;;  %v1052_v46 = vadd.f32 %v1051_v10, %v851_v24  ;;  %v1204_v27 = vpop.f32.mrf.mxu1  ;;  %1118 = vmatmul.f32.gmra.mxu0 %v2316_v19 }
 0x163   :  { %v665_v0 = vadd.f32 %v664_v17, %v501_v45  ;;  %v2327_v17 = vld [vmem:[#allocation15_spill] sm:$0xff] }
 0x164   :  { %v1201_v28 = vadd.f32 %v1200_v37, %v1052_v46  ;;  %951 = vmatmul.f32.gmra.mxu3 %v2317_v58  ;;  %v2328_v46 = vld [vmem:[#allocation30_spill] sm:$0xff] }
 0x165   :  { %1267 = vmatmul.f32.gmra.mxu1 %v2316_v19  ;;  %v521_v40 = vadd.f32 %v2329_v63, %v2328_v46 }
 0x166   :  { %1300 = vst [vmem:[#allocation2 + $0x48] sm:$0xff] %v1201_v28 }
 0x167   :  { %748 = vmatmul.f32.gmra.mxu2 %v2318_v16  ;;  %v856_v13 = vpop.f32.mrf.mxu3  ;;  %v1059_v20 = vpop.f32.mrf.mxu0 }
 0x168   :  { %v857_v44 = vadd.f32 %v856_v13, %v665_v0 }
 0x16a   :  { %v669_v33 = vpop.f32.mrf.mxu2  ;;  %v1056_v50 = vadd.f32 %v1055_v6, %v857_v44  ;;  %v1208_v47 = vpop.f32.mrf.mxu1  ;;  %1122 = vmatmul.f32.gmra.mxu0 %v2319_v8 }
 0x16b   :  { %v670_v22 = vadd.f32 %v669_v33, %v505_v9 }
 0x16c   :  { %v1205_v49 = vadd.f32 %v1204_v27, %v1056_v50  ;;  %957 = vmatmul.f32.gmra.mxu3 %v2320_v34  ;;  %v2332_v34 = vld [vmem:[#allocation17_spill] sm:$0xff] }
 0x16d   :  { %1271 = vmatmul.f32.gmra.mxu1 %v2319_v8 }
 0x16e   :  { %1301 = vst [vmem:[#allocation2 + $0x50] sm:$0xff] %v1205_v49 }
 0x16f   :  { %753 = vmatmul.f32.gmra.mxu2 %v2321_v52  ;;  %v862_v29 = vpop.f32.mrf.mxu3  ;;  %v1063_v60 = vpop.f32.mrf.mxu0 }
 0x170   :  { %v863_v2 = vadd.f32 %v862_v29, %v670_v22 }
 0x172   :  { %v674_v54 = vpop.f32.mrf.mxu2  ;;  %v1060_v35 = vadd.f32 %v1059_v20, %v863_v2  ;;  %v1212_v14 = vpop.f32.mrf.mxu1  ;;  %1126 = vmatmul.f32.gmra.mxu0 %v2322_v1  ;;  %v2331_v20 = vld [vmem:[#allocation16_spill] sm:$0xff] }
 0x173   :  { %v675_v23 = vadd.f32 %v674_v54, %v509_v31 }
 0x174   :  { %v1209_v53 = vadd.f32 %v1208_v47, %v1060_v35  ;;  %963 = vmatmul.f32.gmra.mxu3 %v2323_v43 }
 0x175   :  { %1275 = vmatmul.f32.gmra.mxu1 %v2322_v1  ;;  %v2333_v1 = vld [vmem:[#allocation18_spill] sm:$0xff] }
 0x176   :  { %1302 = vst [vmem:[#allocation2 + $0x58] sm:$0xff] %v1209_v53 }
 0x177   :  { %758 = vmatmul.f32.gmra.mxu2 %v2324_v15  ;;  %v868_v5 = vpop.f32.mrf.mxu3  ;;  %v1067_v48 = vpop.f32.mrf.mxu0 }
 0x178   :  { %v869_v57 = vadd.f32 %v868_v5, %v675_v23 }
 0x17a   :  { %v679_v36 = vpop.f32.mrf.mxu2  ;;  %v1064_v4 = vadd.f32 %v1063_v60, %v869_v57  ;;  %v1216_v55 = vpop.f32.mrf.mxu1  ;;  %1130 = vmatmul.f32.gmra.mxu0 %v1803_v42 }
 0x17b   :  { %v680_v10 = vadd.f32 %v679_v36, %v513_v51  ;;  %v2334_v36 = vld [vmem:[#allocation19_spill] sm:$0xff] }
 0x17c   :  { %v1213_v7 = vadd.f32 %v1212_v14, %v1064_v4  ;;  %969 = vmatmul.f32.gmra.mxu3 %v2325_v39 }
 0x17d   :  { %1279 = vmatmul.f32.gmra.mxu1 %v1803_v42 }
 0x17e   :  { %1303 = vst [vmem:[#allocation2 + $0x60] sm:$0xff] %v1213_v7 }
 0x17f   :  { %763 = vmatmul.f32.gmra.mxu2 %v1846_v32  ;;  %v874_v62 = vpop.f32.mrf.mxu3  ;;  %v1071_v56 = vpop.f32.mrf.mxu0  ;;  %v2330_v32 = vand.u32 4294901760, %v1871_v3 }
 0x180   :  { %v875_v26 = vadd.f32 %v874_v62, %v680_v10 }
 0x182   :  { %v684_v37 = vpop.f32.mrf.mxu2  ;;  %v1068_v18 = vadd.f32 %v1067_v48, %v875_v26  ;;  %v1220_v12 = vpop.f32.mrf.mxu1  ;;  %1134 = vmatmul.f32.gmra.mxu0 %v1831_v25  ;;  %v2335_v26 = vld [vmem:[#allocation20_spill] sm:$0xff] }
 0x183   :  { %v685_v42 = vadd.f32 %v684_v37, %v517_v30 }
 0x184   :  { %v1217_v21 = vadd.f32 %v1216_v55, %v1068_v18  ;;  %975 = vmatmul.f32.gmra.mxu3 %v2326_v41 }
 0x185   :  { %1283 = vmatmul.f32.gmra.mxu1 %v1831_v25 }
 0x186   :  { %1304 = vst [vmem:[#allocation2 + $0x68] sm:$0xff] %v1217_v21 }
 0x187   :  { %768 = vmatmul.f32.gmra.mxu2 %v1871_v3  ;;  %v880_v11 = vpop.f32.mrf.mxu3  ;;  %v1075_v61 = vpop.f32.mrf.mxu0 }
 0x188   :  { %v881_v38 = vadd.f32 %v880_v11, %v685_v42 }
 0x18a   :  { %v689_v59 = vpop.f32.mrf.mxu2  ;;  %v1072_v6 = vadd.f32 %v1071_v56, %v881_v38  ;;  %v1224_v24 = vpop.f32.mrf.mxu1  ;;  %1138 = vmatmul.f32.gmra.mxu0 %v2327_v17 }
 0x18b   :  { %v690_v25 = vadd.f32 %v689_v59, %v521_v40 }
 0x18c   :  { %v1221_v27 = vadd.f32 %v1220_v12, %v1072_v6  ;;  %981 = vmatmul.f32.gmra.mxu3 %v2330_v32 }
 0x18d   :  { %1287 = vmatmul.f32.gmra.mxu1 %v2327_v17 }
 0x18e   :  { %1305 = vst [vmem:[#allocation2 + $0x70] sm:$0xff] %v1221_v27  ;;  %v2337_v27 = vld [vmem:[#allocation22_spill] sm:$0xff] }
 0x18f   :  { %v886_v19 = vpop.f32.mrf.mxu3  ;;  %v1079_v45 = vpop.f32.mrf.mxu0 }
 0x190   :  { %v887_v28 = vadd.f32 %v886_v19, %v690_v25 }
 0x192   :  { %v694_v58 = vpop.f32.mrf.mxu2  ;;  %v1076_v0 = vadd.f32 %v1075_v61, %v887_v28  ;;  %v1228_v16 = vpop.f32.mrf.mxu1  ;;  %v2336_v61 = vld [vmem:[#allocation21_spill] sm:$0xff] }
 0x193   :  { %v695_v44 = vadd.f32 %v694_v58, %v2331_v20 }
 0x194   :  { %v1225_v13 = vadd.f32 %v1224_v24, %v1076_v0 }
 0x196   :  { %1306 = vst [vmem:[#allocation2 + $0x78] sm:$0xff] %v1225_v13  ;;  %v2338_v13 = vld [vmem:[#allocation23_spill] sm:$0xff] }
 0x197   :  { %v892_v33 = vpop.f32.mrf.mxu3  ;;  %v1083_v50 = vpop.f32.mrf.mxu0 }
 0x198   :  { %v893_v47 = vadd.f32 %v892_v33, %v695_v44 }
 0x19a   :  { %v699_v8 = vpop.f32.mrf.mxu2  ;;  %v1080_v3 = vadd.f32 %v1079_v45, %v893_v47  ;;  %v1232_v9 = vpop.f32.mrf.mxu1 }
 0x19b   :  { %v700_v22 = vadd.f32 %v699_v8, %v2332_v34 }
 0x19c   :  { %v1229_v49 = vadd.f32 %v1228_v16, %v1080_v3 }
 0x19e   :  { %1307 = vst [vmem:[#allocation2 + $0x80] sm:$0xff] %v1229_v49  ;;  %v2339_v49 = vld [vmem:[#allocation24_spill] sm:$0xff] }
 0x19f   :  { %v898_v52 = vpop.f32.mrf.mxu3  ;;  %v1087_v29 = vpop.f32.mrf.mxu0 }
 0x1a0   :  { %v899_v60 = vadd.f32 %v898_v52, %v700_v22 }
 0x1a2   :  { %v704_v2 = vpop.f32.mrf.mxu2  ;;  %v1084_v54 = vadd.f32 %v1083_v50, %v899_v60  ;;  %v1236_v35 = vpop.f32.mrf.mxu1 }
 0x1a3   :  { %v705_v31 = vadd.f32 %v704_v2, %v2333_v1 }
 0x1a4   :  { %v1233_v14 = vadd.f32 %v1232_v9, %v1084_v54 }
 0x1a6   :  { %1308 = vst [vmem:[#allocation2 + $0x88] sm:$0xff] %v1233_v14  ;;  %v2340_v14 = vld [vmem:[#allocation25_spill] sm:$0xff] }
 0x1a7   :  { %v904_v53 = vpop.f32.mrf.mxu3  ;;  %v1091_v43 = vpop.f32.mrf.mxu0 }
 0x1a8   :  { %v905_v23 = vadd.f32 %v904_v53, %v705_v31 }
 0x1aa   :  { %v709_v15 = vpop.f32.mrf.mxu2  ;;  %v1088_v5 = vadd.f32 %v1087_v29, %v905_v23  ;;  %v1240_v48 = vpop.f32.mrf.mxu1 }
 0x1ab   :  { %v710_v4 = vadd.f32 %v709_v15, %v2334_v36 }
 0x1ac   :  { %v1237_v57 = vadd.f32 %v1236_v35, %v1088_v5 }
 0x1ae   :  { %1309 = vst [vmem:[#allocation2 + $0x90] sm:$0xff] %v1237_v57  ;;  %v2341_v57 = vld [vmem:[#allocation26_spill] sm:$0xff] }
 0x1af   :  { %v910_v55 = vpop.f32.mrf.mxu3  ;;  %v1095_v51 = vpop.f32.mrf.mxu0 }
 0x1b0   :  { %v911_v7 = vadd.f32 %v910_v55, %v710_v4 }
 0x1b2   :  { %v714_v39 = vpop.f32.mrf.mxu2  ;;  %v1092_v10 = vadd.f32 %v1091_v43, %v911_v7  ;;  %v1244_v62 = vpop.f32.mrf.mxu1 }
 0x1b3   :  { %v715_v37 = vadd.f32 %v714_v39, %v2335_v26 }
 0x1b4   :  { %v1241_v56 = vadd.f32 %v1240_v48, %v1092_v10 }
 0x1b6   :  { %1310 = vst [vmem:[#allocation2 + $0x98] sm:$0xff] %v1241_v56  ;;  %v2342_v56 = vld [vmem:[#allocation27_spill] sm:$0xff] }
 0x1b7   :  { %v916_v18 = vpop.f32.mrf.mxu3  ;;  %v1099_v12 = vpop.f32.mrf.mxu0 }
 0x1b8   :  { %v917_v30 = vadd.f32 %v916_v18, %v715_v37 }
 0x1ba   :  { %v719_v21 = vpop.f32.mrf.mxu2  ;;  %v1096_v41 = vadd.f32 %v1095_v51, %v917_v30  ;;  %v1248_v42 = vpop.f32.mrf.mxu1 }
 0x1bb   :  { %v720_v38 = vadd.f32 %v719_v21, %v2336_v61 }
 0x1bc   :  { %v1245_v11 = vadd.f32 %v1244_v62, %v1096_v41 }
 0x1be   :  { %1311 = vst [vmem:[#allocation2 + $0xa0] sm:$0xff] %v1245_v11  ;;  %v2343_v11 = vld [vmem:[#allocation28_spill] sm:$0xff] }
 0x1bf   :  { %v922_v59 = vpop.f32.mrf.mxu3  ;;  %v1103_v6 = vpop.f32.mrf.mxu0 }
 0x1c0   :  { %v923_v24 = vadd.f32 %v922_v59, %v720_v38 }
 0x1c2   :  { %v724_v17 = vpop.f32.mrf.mxu2  ;;  %v1100_v46 = vadd.f32 %v1099_v12, %v923_v24  ;;  %v1252_v63 = vpop.f32.mrf.mxu1 }
 0x1c3   :  { %v725_v32 = vadd.f32 %v724_v17, %v2337_v27 }
 0x1c4   :  { %v1249_v40 = vadd.f32 %v1248_v42, %v1100_v46 }
 0x1c6   :  { %1312 = vst [vmem:[#allocation2 + $0xa8] sm:$0xff] %v1249_v40  ;;  %v2344_v40 = vld [vmem:[#allocation29_spill] sm:$0xff] }
 0x1c7   :  { %v928_v25 = vpop.f32.mrf.mxu3  ;;  %v1107_v19 = vpop.f32.mrf.mxu0 }
 0x1c8   :  { %v929_v45 = vadd.f32 %v928_v25, %v725_v32 }
 0x1ca   :  { %v729_v28 = vpop.f32.mrf.mxu2  ;;  %v1104_v58 = vadd.f32 %v1103_v6, %v929_v45  ;;  %v1256_v0 = vpop.f32.mrf.mxu1 }
 0x1cb   :  { %v730_v20 = vadd.f32 %v729_v28, %v2338_v13 }
 0x1cc   :  { %v1253_v16 = vadd.f32 %v1252_v63, %v1104_v58 }
 0x1ce   :  { %1313 = vst [vmem:[#allocation2 + $0xb0] sm:$0xff] %v1253_v16 }
 0x1cf   :  { %v934_v44 = vpop.f32.mrf.mxu3  ;;  %v1111_v33 = vpop.f32.mrf.mxu0 }
 0x1d0   :  { %v935_v50 = vadd.f32 %v934_v44, %v730_v20 }
 0x1d2   :  { %v734_v47 = vpop.f32.mrf.mxu2  ;;  %v1108_v8 = vadd.f32 %v1107_v19, %v935_v50  ;;  %v1260_v3 = vpop.f32.mrf.mxu1 }
 0x1d3   :  { %v735_v34 = vadd.f32 %v734_v47, %v2339_v49 }
 0x1d4   :  { %v1257_v9 = vadd.f32 %v1256_v0, %v1108_v8  ;;  %v2345_v0 = vld [vmem:[#allocation31_spill] sm:$0xff]  ;;  %v2346_v8 = vld [vmem:[#allocation33_spill] sm:$0xff] }
 0x1d6   :  { %1314 = vst [vmem:[#allocation2 + $0xb8] sm:$0xff] %v1257_v9 }
 0x1d7   :  { %v940_v22 = vpop.f32.mrf.mxu3  ;;  %v1115_v52 = vpop.f32.mrf.mxu0 }
 0x1d8   :  { %v941_v29 = vadd.f32 %v940_v22, %v735_v34 }
 0x1da   :  { %v739_v60 = vpop.f32.mrf.mxu2  ;;  %v1112_v2 = vadd.f32 %v1111_v33, %v941_v29  ;;  %v1264_v54 = vpop.f32.mrf.mxu1 }
 0x1db   :  { %v740_v1 = vadd.f32 %v739_v60, %v2340_v14 }
 0x1dc   :  { %v1261_v35 = vadd.f32 %v1260_v3, %v1112_v2 }
 0x1de   :  { %1315 = vst [vmem:[#allocation2 + $0xc0] sm:$0xff] %v1261_v35 }
 0x1df   :  { %v946_v31 = vpop.f32.mrf.mxu3  ;;  %v1119_v53 = vpop.f32.mrf.mxu0 }
 0x1e0   :  { %v947_v43 = vadd.f32 %v946_v31, %v740_v1 }
 0x1e2   :  { %v744_v23 = vpop.f32.mrf.mxu2  ;;  %v1116_v15 = vadd.f32 %v1115_v52, %v947_v43  ;;  %v1268_v5 = vpop.f32.mrf.mxu1 }
 0x1e3   :  { %v745_v36 = vadd.f32 %v744_v23, %v2341_v57 }
 0x1e4   :  { %v1265_v48 = vadd.f32 %v1264_v54, %v1116_v15 }
 0x1e6   :  { %1316 = vst [vmem:[#allocation2 + $0xc8] sm:$0xff] %v1265_v48 }
 0x1e7   :  { %v952_v4 = vpop.f32.mrf.mxu3  ;;  %v1123_v55 = vpop.f32.mrf.mxu0 }
 0x1e8   :  { %v953_v51 = vadd.f32 %v952_v4, %v745_v36 }
 0x1ea   :  { %v749_v7 = vpop.f32.mrf.mxu2  ;;  %v1120_v39 = vadd.f32 %v1119_v53, %v953_v51  ;;  %v1272_v10 = vpop.f32.mrf.mxu1 }
 0x1eb   :  { %v750_v26 = vadd.f32 %v749_v7, %v2342_v56 }
 0x1ec   :  { %v1269_v62 = vadd.f32 %v1268_v5, %v1120_v39 }
 0x1ee   :  { %1317 = vst [vmem:[#allocation2 + $0xd0] sm:$0xff] %v1269_v62 }
 0x1ef   :  { %v958_v37 = vpop.f32.mrf.mxu3  ;;  %v1127_v12 = vpop.f32.mrf.mxu0 }
 0x1f0   :  { %v959_v18 = vadd.f32 %v958_v37, %v750_v26 }
 0x1f2   :  { %v754_v30 = vpop.f32.mrf.mxu2  ;;  %v1124_v21 = vadd.f32 %v1123_v55, %v959_v18  ;;  %v1276_v41 = vpop.f32.mrf.mxu1 }
 0x1f3   :  { %v755_v61 = vadd.f32 %v754_v30, %v2343_v11 }
 0x1f4   :  { %v1273_v42 = vadd.f32 %v1272_v10, %v1124_v21 }
 0x1f6   :  { %1318 = vst [vmem:[#allocation2 + $0xd8] sm:$0xff] %v1273_v42 }
 0x1f7   :  { %v964_v38 = vpop.f32.mrf.mxu3  ;;  %v1131_v17 = vpop.f32.mrf.mxu0 }
 0x1f8   :  { %v965_v59 = vadd.f32 %v964_v38, %v755_v61 }
 0x1fa   :  { %v759_v6 = vpop.f32.mrf.mxu2  ;;  %v1128_v24 = vadd.f32 %v1127_v12, %v965_v59  ;;  %v1280_v63 = vpop.f32.mrf.mxu1 }
 0x1fb   :  { %v760_v27 = vadd.f32 %v759_v6, %v2344_v40 }
 0x1fc   :  { %v1277_v46 = vadd.f32 %v1276_v41, %v1128_v24 }
 0x1fe   :  { %1319 = vst [vmem:[#allocation2 + $0xe0] sm:$0xff] %v1277_v46 }
 0x1ff   :  { %v970_v32 = vpop.f32.mrf.mxu3  ;;  %v1135_v58 = vpop.f32.mrf.mxu0 }
 0x200   :  { %v971_v25 = vadd.f32 %v970_v32, %v760_v27 }
 0x202   :  { %v764_v19 = vpop.f32.mrf.mxu2  ;;  %v1132_v45 = vadd.f32 %v1131_v17, %v971_v25  ;;  %v1284_v20 = vpop.f32.mrf.mxu1 }
 0x203   :  { %v765_v16 = vadd.f32 %v764_v19, %v2345_v0 }
 0x204   :  { %v1281_v28 = vadd.f32 %v1280_v63, %v1132_v45 }
 0x206   :  { %1320 = vst [vmem:[#allocation2 + $0xe8] sm:$0xff] %v1281_v28 }
 0x207   :  { %v976_v13 = vpop.f32.mrf.mxu3  ;;  %v1139_v49 = vpop.f32.mrf.mxu0 }
 0x208   :  { %v977_v44 = vadd.f32 %v976_v13, %v765_v16 }
 0x20a   :  { %v1136_v33 = vadd.f32 %v1135_v58, %v977_v44  ;;  %v769_v50 = vpop.f32.mrf.mxu2  ;;  %v1288_v22 = vpop.f32.mrf.mxu1 }
 0x20b   :  { %v770_v3 = vadd.f32 %v769_v50, %v2346_v8 }
 0x20c   :  { %v1285_v47 = vadd.f32 %v1284_v20, %v1136_v33 }
 0x20e   :  { %1321 = vst [vmem:[#allocation2 + $0xf0] sm:$0xff] %v1285_v47 }
 0x20f   :  { %v982_v9 = vpop.f32.mrf.mxu3 }
 0x210   :  { %v983_v34 = vadd.f32 %v982_v9, %v770_v3 }
 0x212   :  { %v1140_v52 = vadd.f32 %v1139_v49, %v983_v34 }
 0x214   :  { %v1289_v29 = vadd.f32 %v1288_v22, %v1140_v52 }
 0x216   :  { %1322 = vst [vmem:[#allocation2 + $0xf8] sm:$0xff] %v1289_v29 }
 0x217   :  { %1335 = dma.vmem_to_hbm [thread:$0]  %s1328_s23, 4096, %s1330_s25, [#allocation3], %s1379_s26, %s1379_s26, %s1380_s27  }
 0x218   :  { %1376 = dma.done.wait [#allocation3], 4096  }
 0x219   :  { %1377 = vsyncadd [#allocation3], 4294963200 }
 0x21a   :  { %1340 = vsyncpa [#allocation3], 1 }

</bundles_post_ra>
